<compile_context>
chip_gen: v5e
topology: v5e:2x2
jax: 0.10.0
libtpu: 0.0.40
codegen_flags: <defaults>
</compile_context>

<pallas_src>
import functools

import jax
import jax.numpy as jnp
from jax import lax
from jax.experimental import pallas as pl
from jax.experimental.pallas import tpu as pltpu

LRELU_SLOPE = 0.1
_HALO_GROUPS = 8          # halo block height (multiple of 8, >= max tap offset)
_DEFAULT_TH_MAX = 256     # max output rows per tile (multiple of 8)


def _round_up(x, m):
    return ((x + m - 1) // m) * m


# ----------------------------------------------------------------------------
# Pallas kernel: fused K-tap conv (as matmuls / VPU MACs) + bias + LeakyReLU
# ----------------------------------------------------------------------------
def _conv_h_kernel(m_ref, h_ref, w_ref, b_ref, o_ref, xt_ref,
                   *, K, s, Cin, Cout, TH, slope, apply_act):
    # Stage main tile (TH groups) + halo (next 8 groups) into one contiguous
    # VMEM scratch so the K taps become unit-offset row slices.
    xt_ref[pl.ds(0, TH), :] = m_ref[0]
    xt_ref[pl.ds(TH, _HALO_GROUPS), :] = h_ref[0]

    acc = jnp.zeros((TH, Cout), dtype=jnp.float32)

    if Cin == 1:
        # First layer: contraction depth K=5 -> use VPU broadcast MACs.
        for k in range(K):
            q, r = k // s, k % s
            xk = xt_ref[pl.ds(q, TH), pl.ds(r, 1)]            # (TH, 1)
            wk = w_ref[pl.ds(k, 1), :]                        # (1, Cout)
            acc = acc + xk * wk
    else:
        # Group offsets q cover taps [q*s, q*s + n_r): one MXU matmul each,
        # f32 accumulation between them.
        n_q = (K - 1) // s + 1
        for q in range(n_q):
            n_r = min(s, K - q * s)
            xq = xt_ref[pl.ds(q, TH), pl.ds(0, n_r * Cin)]    # (TH, n_r*Cin)
            wq = w_ref[pl.ds(q * s * Cin, n_r * Cin), :]      # (n_r*Cin, Cout)
            acc = acc + jnp.dot(xq, wq, preferred_element_type=jnp.float32)

    y = acc + b_ref[...]
    if apply_act:
        y = jnp.where(y >= 0.0, y, slope * y)
    o_ref[0] = y.astype(o_ref.dtype)


# ----------------------------------------------------------------------------
# One conv layer: wrapper builds the grouped view + halo specs, no HBM im2col
# ----------------------------------------------------------------------------
def conv_layer_pallas(x, w3, bias, K, s, pad, apply_act, th_max=_DEFAULT_TH_MAX):
    """x: (G, H, Cin) f32; w3: (Cout, Cin, K); bias: (Cout,) -> (G, H_out, Cout)."""
    assert th_max % 8 == 0
    G, H, Cin = x.shape
    Cout = w3.shape[0]
    H_out = (H + 2 * pad - K) // s + 1

    TH = min(th_max, _round_up(H_out, 8))          # output rows per tile
    nT = pl.cdiv(H_out, TH)                        # number of H tiles
    n_groups = nT * TH + _HALO_GROUPS              # stride-groups incl. halo tail
    total_rows = n_groups * s

    # Zero pad (conv's own padding + round-up to full tiles/halo), then view as
    # stride groups: (G, n_groups, s*Cin).  This is a reshape, not an im2col.
    pad_hi = total_rows - pad - H
    xp = jnp.pad(x, ((0, 0), (pad, pad_hi), (0, 0)))
    xg = xp.reshape(G, n_groups, s * Cin)

    # Weight flattened as (k, cin) rows -> matches the grouped column order.
    w2 = jnp.transpose(w3, (2, 1, 0)).reshape(K * Cin, Cout)
    b2 = bias.reshape(1, Cout)

    kernel = functools.partial(
        _conv_h_kernel, K=K, s=s, Cin=Cin, Cout=Cout, TH=TH,
        slope=LRELU_SLOPE, apply_act=apply_act)

    flops = 2 * G * nT * TH * K * Cin * Cout
    bytes_accessed = 4 * (G * n_groups * s * Cin + K * Cin * Cout
                          + Cout + G * nT * TH * Cout)

    out = pl.pallas_call(
        kernel,
        out_shape=jax.ShapeDtypeStruct((G, nT * TH, Cout), jnp.float32),
        grid_spec=pltpu.PrefetchScalarGridSpec(
            num_scalar_prefetch=0,
            grid=(G, nT),
            in_specs=[
                # main tile: TH stride-groups, streamed / double-buffered
                pl.BlockSpec((1, TH, s * Cin), lambda g, i: (g, i, 0)),
                # halo: first 8 groups of the NEXT tile (same underlying array)
                pl.BlockSpec((1, _HALO_GROUPS, s * Cin),
                             lambda g, i: (g, (i + 1) * (TH // _HALO_GROUPS), 0)),
                # weights + bias: constant index_map -> DMA'd once, resident
                pl.BlockSpec((K * Cin, Cout), lambda g, i: (0, 0)),
                pl.BlockSpec((1, Cout), lambda g, i: (0, 0)),
            ],
            out_specs=pl.BlockSpec((1, TH, Cout), lambda g, i: (g, i, 0)),
            scratch_shapes=[pltpu.VMEM((TH + _HALO_GROUPS, s * Cin), jnp.float32)],
        ),
        compiler_params=pltpu.CompilerParams(
            dimension_semantics=("parallel", "parallel"),
            vmem_limit_bytes=48 << 20,   # <= v7x 64 MiB physical, with headroom
        ),
        cost_estimate=pl.CostEstimate(
            flops=flops, transcendentals=0, bytes_accessed=bytes_accessed),
    )(xg, xg, w2, b2)

    return out[:, :H_out, :]


# ----------------------------------------------------------------------------
# Parameters (deterministic, weight-norm style init like WNConv2d)
# ----------------------------------------------------------------------------
_LAYER_CFG = [
    # (C_in, C_out, K, stride, pad, leaky_relu_after)
    (1, 32, 5, 3, 2, True),
    (32, 64, 5, 3, 2, True),
    (64, 128, 5, 3, 2, True),
    (128, 512, 5, 3, 2, True),
    (512, 1024, 5, 1, 2, True),
    (1024, 1, 3, 1, 1, False),
]


def init_params(key):
    params = []
    for (c_in, c_out, k, _, _, _) in _LAYER_CFG:
        key, kv, kb = jax.random.split(key, 3)
        v = 0.05 * jax.random.normal(kv, (c_out, c_in, k, 1), dtype=jnp.float32)
        # weight_norm: w = g * v / ||v||, with g initialized to ||v||
        norm = jnp.sqrt(jnp.sum(v * v, axis=(1, 2, 3), keepdims=True)) + 1e-12
        g = norm
        w = g * v / norm
        b = 0.01 * jax.random.normal(kb, (c_out,), dtype=jnp.float32)
        params.append((w, b))
    return params


# ----------------------------------------------------------------------------
# Forward pass (Pallas) and pure-JAX reference
# ----------------------------------------------------------------------------
def _to_nchw(x_ghc, B, W):
    G, H, C = x_ghc.shape
    return jnp.transpose(x_ghc.reshape(B, W, H, C), (0, 3, 2, 1))


def mpd_forward_pallas(wav, params, p, th_max=_DEFAULT_TH_MAX):
    B, Cw, T = wav.shape
    if T % p != 0:
        r = p - T % p
        wav = jnp.pad(wav, ((0, 0), (0, 0), (0, r)), mode="reflect")
    H = wav.shape[-1] // p
    x = wav.reshape(B, Cw, H, p)                               # NCHW
    x = jnp.transpose(x, (0, 3, 2, 1)).reshape(B * p, H, Cw)   # (G, H, Cin)

    feature_maps = []
    for (w, b), (_, _, k, s, pad, act) in zip(params, _LAYER_CFG):
        x = conv_layer_pallas(x, w[..., 0], b, k, s, pad, act, th_max=th_max)
        if act:
            feature_maps.append(_to_nchw(x, B, p))
    x_nchw = _to_nchw(x, B, p)
    feature_maps.append(x_nchw)
    flat = x_nchw.reshape(B, -1)                               # torch.flatten(x, 1, -1)
    return flat, feature_maps


def mpd_forward_ref(wav, params, p):
    if wav.shape[-1] % p != 0:
        r = p - wav.shape[-1] % p
        wav = jnp.pad(wav, ((0, 0), (0, 0), (0, r)), mode="reflect")
    x = wav.reshape(wav.shape[0], wav.shape[1], wav.shape[-1] // p, p)
    feature_maps = []
    for (w, b), (_, _, k, s, pad, act) in zip(params, _LAYER_CFG):
        x = lax.conv_general_dilated(
            x, w, window_strides=(s, 1),
            padding=[(pad, pad), (0, 0)],
            dimension_numbers=("NCHW", "OIHW", "NCHW"),
        ) + b.reshape(1, -1, 1, 1)
        if act:
            x = jnp.where(x >= 0.0, x, LRELU_SLOPE * x)
            feature_maps.append(x)
    feature_maps.append(x)
    return x.reshape(x.shape[0], -1), feature_maps


# ----------------------------------------------------------------------------
if __name__ == "__main__":
    key = jax.random.PRNGKey(0)
    kp, kx1, kx2 = jax.random.split(key, 3)
    params = init_params(kp)

    def check(wav, p, th_max):
        flat, fmaps = mpd_forward_pallas(wav, params, p, th_max=th_max)
        flat = jax.block_until_ready(flat)
        fmaps = [jax.block_until_ready(f) for f in fmaps]
        flat_ref, fmaps_ref = mpd_forward_ref(wav, params, p)
        assert flat.shape == flat_ref.shape and flat.dtype == flat_ref.dtype
        assert len(fmaps) == len(fmaps_ref) == 6
        for a, b in zip(fmaps, fmaps_ref):
            assert a.shape == b.shape and a.dtype == b.dtype
            assert jnp.allclose(a, b, atol=2e-4, rtol=2e-4)
        assert jnp.allclose(flat, flat_ref, atol=2e-4, rtol=2e-4)

    # small, module-consistent shapes: wav (B=2, C=1, T=46), period p=4
    # (T % p != 0 so the reflect-pad branch is exercised)
    wav1 = jax.random.normal(kx1, (2, 1, 46), dtype=jnp.float32)
    check(wav1, p=4, th_max=_DEFAULT_TH_MAX)

    # slightly longer input with a tiny tile cap so the multi-tile / halo path
    # is exercised for both the VPU (layer 1) and MXU (layers 2+) branches.
    wav2 = jax.random.normal(kx2, (2, 1, 402), dtype=jnp.float32)
    check(wav2, p=4, th_max=8)

    print("KERNEL_OK")
</pallas_src>

<mosaic_0001>
module attributes {stable_mosaic.version = 11 : i64} {
  func.func @_conv_h_kernel(%arg0: i32, %arg1: i32, %arg2: memref<1x8x3xf32, #tpu.memory_space<vmem>>, %arg3: memref<1x8x3xf32, #tpu.memory_space<vmem>>, %arg4: memref<5x32xf32, #tpu.memory_space<vmem>>, %arg5: memref<1x32xf32, #tpu.memory_space<vmem>>, %arg6: memref<1x8x32xf32, #tpu.memory_space<vmem>>, %arg7: memref<16x3xf32, #tpu.memory_space<vmem>>) attributes {dimension_semantics = [#tpu.dimension_semantics<parallel>, #tpu.dimension_semantics<parallel>], iteration_bounds = array<i64: 8, 1>, scalar_prefetch = 0 : i64, scratch_operands = 1 : i64, tpu.core_type = #tpu.core_type<tc>, window_params = [{transform_indices = @transform_0, window_bounds = array<i64: 1, 8, 3>}, {transform_indices = @transform_1, window_bounds = array<i64: 1, 8, 3>}, {pipeline_mode = #tpu.pipeline_mode<synchronous>, transform_indices = @transform_2, window_bounds = array<i64: 5, 32>}, {pipeline_mode = #tpu.pipeline_mode<synchronous>, transform_indices = @transform_3, window_bounds = array<i64: 1, 32>}, {transform_indices = @transform_4, window_bounds = array<i64: 1, 8, 32>}]} {
    %c0 = arith.constant 0 : index
    %c0_0 = arith.constant 0 : index
    %c0_1 = arith.constant 0 : index
    %0 = vector.load %arg2[%c0, %c0_0, %c0_1] : memref<1x8x3xf32, #tpu.memory_space<vmem>>, vector<1x8x3xf32>
    %1 = vector.shape_cast %0 : vector<1x8x3xf32> to vector<8x3xf32>
    %c0_2 = arith.constant 0 : index
    %c0_3 = arith.constant 0 : index
    %2 = vector.load %arg7[%c0_2, %c0_3] : memref<16x3xf32, #tpu.memory_space<vmem>>, vector<8x3xf32>
    tpu.vector_store %arg7[%c0_2, %c0_3], %1 {strides = array<i32>} : memref<16x3xf32, #tpu.memory_space<vmem>>, vector<8x3xf32>,
    %c0_4 = arith.constant 0 : index
    %c0_5 = arith.constant 0 : index
    %c0_6 = arith.constant 0 : index
    %3 = vector.load %arg3[%c0_4, %c0_5, %c0_6] : memref<1x8x3xf32, #tpu.memory_space<vmem>>, vector<1x8x3xf32>
    %4 = vector.shape_cast %3 : vector<1x8x3xf32> to vector<8x3xf32>
    %c8 = arith.constant 8 : index
    %c0_7 = arith.constant 0 : index
    %5 = vector.load %arg7[%c8, %c0_7] : memref<16x3xf32, #tpu.memory_space<vmem>>, vector<8x3xf32>
    tpu.vector_store %arg7[%c8, %c0_7], %4 {strides = array<i32>} : memref<16x3xf32, #tpu.memory_space<vmem>>, vector<8x3xf32>,
    %cst = arith.constant 0.000000e+00 : f32
    %6 = vector.broadcast %cst : f32 to vector<8x32xf32>
    %c0_8 = arith.constant 0 : index
    %c0_9 = arith.constant 0 : index
    %7 = vector.load %arg7[%c0_8, %c0_9] : memref<16x3xf32, #tpu.memory_space<vmem>>, vector<8x1xf32>
    %c0_10 = arith.constant 0 : index
    %c0_11 = arith.constant 0 : index
    %8 = vector.load %arg4[%c0_10, %c0_11] : memref<5x32xf32, #tpu.memory_space<vmem>>, vector<1x32xf32>
    %9 = vector.broadcast %7 : vector<8x1xf32> to vector<8x32xf32>
    %10 = vector.broadcast %8 : vector<1x32xf32> to vector<8x32xf32>
    %11 = arith.mulf %9, %10 : vector<8x32xf32>
    %12 = arith.addf %6, %11 : vector<8x32xf32>
    %c0_12 = arith.constant 0 : index
    %c1 = arith.constant 1 : index
    %13 = vector.load %arg7[%c0_12, %c1] : memref<16x3xf32, #tpu.memory_space<vmem>>, vector<8x1xf32>
    %c1_13 = arith.constant 1 : index
    %c0_14 = arith.constant 0 : index
    %14 = vector.load %arg4[%c1_13, %c0_14] : memref<5x32xf32, #tpu.memory_space<vmem>>, vector<1x32xf32>
    %15 = vector.broadcast %13 : vector<8x1xf32> to vector<8x32xf32>
    %16 = vector.broadcast %14 : vector<1x32xf32> to vector<8x32xf32>
    %17 = arith.mulf %15, %16 : vector<8x32xf32>
    %18 = arith.addf %12, %17 : vector<8x32xf32>
    %c0_15 = arith.constant 0 : index
    %c2 = arith.constant 2 : index
    %19 = vector.load %arg7[%c0_15, %c2] : memref<16x3xf32, #tpu.memory_space<vmem>>, vector<8x1xf32>
    %c2_16 = arith.constant 2 : index
    %c0_17 = arith.constant 0 : index
    %20 = vector.load %arg4[%c2_16, %c0_17] : memref<5x32xf32, #tpu.memory_space<vmem>>, vector<1x32xf32>
    %21 = vector.broadcast %19 : vector<8x1xf32> to vector<8x32xf32>
    %22 = vector.broadcast %20 : vector<1x32xf32> to vector<8x32xf32>
    %23 = arith.mulf %21, %22 : vector<8x32xf32>
    %24 = arith.addf %18, %23 : vector<8x32xf32>
    %c1_18 = arith.constant 1 : index
    %c0_19 = arith.constant 0 : index
    %25 = vector.load %arg7[%c1_18, %c0_19] : memref<16x3xf32, #tpu.memory_space<vmem>>, vector<8x1xf32>
    %c3 = arith.constant 3 : index
    %c0_20 = arith.constant 0 : index
    %26 = vector.load %arg4[%c3, %c0_20] : memref<5x32xf32, #tpu.memory_space<vmem>>, vector<1x32xf32>
    %27 = vector.broadcast %25 : vector<8x1xf32> to vector<8x32xf32>
    %28 = vector.broadcast %26 : vector<1x32xf32> to vector<8x32xf32>
    %29 = arith.mulf %27, %28 : vector<8x32xf32>
    %30 = arith.addf %24, %29 : vector<8x32xf32>
    %c1_21 = arith.constant 1 : index
    %c1_22 = arith.constant 1 : index
    %31 = vector.load %arg7[%c1_21, %c1_22] : memref<16x3xf32, #tpu.memory_space<vmem>>, vector<8x1xf32>
    %c4 = arith.constant 4 : index
    %c0_23 = arith.constant 0 : index
    %32 = vector.load %arg4[%c4, %c0_23] : memref<5x32xf32, #tpu.memory_space<vmem>>, vector<1x32xf32>
    %33 = vector.broadcast %31 : vector<8x1xf32> to vector<8x32xf32>
    %34 = vector.broadcast %32 : vector<1x32xf32> to vector<8x32xf32>
    %35 = arith.mulf %33, %34 : vector<8x32xf32>
    %36 = arith.addf %30, %35 : vector<8x32xf32>
    %c0_24 = arith.constant 0 : index
    %c0_25 = arith.constant 0 : index
    %37 = vector.load %arg5[%c0_24, %c0_25] : memref<1x32xf32, #tpu.memory_space<vmem>>, vector<1x32xf32>
    %38 = vector.broadcast %37 : vector<1x32xf32> to vector<8x32xf32>
    %39 = arith.addf %36, %38 : vector<8x32xf32>
    %cst_26 = arith.constant 0.000000e+00 : f32
    %40 = vector.broadcast %cst_26 : f32 to vector<8x32xf32>
    %41 = arith.cmpf oge, %39, %40 : vector<8x32xf32>
    %cst_27 = arith.constant 1.000000e-01 : f32
    %42 = vector.broadcast %cst_27 : f32 to vector<8x32xf32>
    %43 = arith.mulf %42, %39 : vector<8x32xf32>
    %44 = arith.select %41, %39, %43 : vector<8x32xi1>, vector<8x32xf32>
    %c0_28 = arith.constant 0 : index
    %c0_29 = arith.constant 0 : index
    %c0_30 = arith.constant 0 : index
    %45 = vector.load %arg6[%c0_28, %c0_29, %c0_30] : memref<1x8x32xf32, #tpu.memory_space<vmem>>, vector<1x8x32xf32>
    %46 = vector.shape_cast %45 : vector<1x8x32xf32> to vector<8x32xf32>
    %47 = vector.shape_cast %44 : vector<8x32xf32> to vector<1x8x32xf32>
    tpu.vector_store %arg6[%c0_28, %c0_29, %c0_30], %47 {strides = array<i32>} : memref<1x8x32xf32, #tpu.memory_space<vmem>>, vector<1x8x32xf32>,
    return
  }
  func.func @transform_0(%arg0: i32, %arg1: i32) -> (i32, i32, i32) {
    %c0_i32 = arith.constant 0 : i32
    %c0_i32_0 = arith.constant 0 : i32
    return %arg0, %arg1, %c0_i32 : i32, i32, i32
  }
  func.func @transform_1(%arg0: i32, %arg1: i32) -> (i32, i32, i32) {
    %c1_i32 = arith.constant 1 : i32
    %0 = arith.addi %arg1, %c1_i32 : i32
    %c1_i32_0 = arith.constant 1 : i32
    %1 = arith.muli %0, %c1_i32_0 : i32
    %c0_i32 = arith.constant 0 : i32
    %c0_i32_1 = arith.constant 0 : i32
    return %arg0, %1, %c0_i32 : i32, i32, i32
  }
  func.func @transform_2(%arg0: i32, %arg1: i32) -> (i32, i32) {
    %c0_i32 = arith.constant 0 : i32
    %c0_i32_0 = arith.constant 0 : i32
    %c0_i32_1 = arith.constant 0 : i32
    return %c0_i32, %c0_i32_0 : i32, i32
  }
  func.func @transform_3(%arg0: i32, %arg1: i32) -> (i32, i32) {
    %c0_i32 = arith.constant 0 : i32
    %c0_i32_0 = arith.constant 0 : i32
    %c0_i32_1 = arith.constant 0 : i32
    return %c0_i32, %c0_i32_0 : i32, i32
  }
  func.func @transform_4(%arg0: i32, %arg1: i32) -> (i32, i32, i32) {
    %c0_i32 = arith.constant 0 : i32
    %c0_i32_0 = arith.constant 0 : i32
    return %arg0, %arg1, %c0_i32 : i32, i32, i32
  }
}

</mosaic_0001>

<bundles_post_ra>
// kernel: tpu_custom_call.1
= control target key start
LH: loop header
LB: loop body
LE: loop exit
PB: predicated region body
PF: predicated region fallthrough
CT: control target
= control target key end

     0   :  { %9 = vsyncpa [#allocation4], 0  ;;  %s740_s0 = inlined_call_operand.vmem [shape: f32[8,16,3], index: 0, kind: input, shape index: {}]   ;;  %s741_s1 = inlined_call_operand.vmem [shape: f32[8,16,3], index: 1, kind: input, shape index: {}]   ;;  %s742_s2 = inlined_call_operand.vmem [shape: f32[5,32], index: 2, kind: input, shape index: {}]   ;;  %s743_s3 = inlined_call_operand.vmem [shape: f32[1,32], index: 3, kind: input, shape index: {}]   ;;  %s744_s4 = inlined_call_operand.hbm [shape: f32[8,8,32], index: 4, kind: output, shape index: {}]  }
   0x1   :  { %11 = vsyncpa [#allocation4 + $0x1], 0  ;;  %s622_s15 = smov 0   ;;  %s624_s16 = smov 0  }
   0x2   :  { %s626_s17 = smov 0   ;;  %s628_s18 = smov 0  }
   0x3   :  { %s630_s19 = smov 0   ;;  %s632_s20 = smov 0  }
   0x4 LB: > { %s427_s21 = sadd.s32 4294967295, %s592_s20   ;;  %s428_s22 = sadd.s32 4294967294, %s592_s20   ;;  %s592_s20 = sphi %s632_s20, %s17_s20   ;;  %s588_s19 = sphi %s630_s19, %s751_s19   ;;  %s584_s18 = sphi %s628_s18, %s750_s18   ;;  %s580_s17 = sphi %s626_s17, %s749_s17   ;;  %s576_s16 = sphi %s624_s16, %s748_s16   ;;  %s572_s15 = sphi %s622_s15, %s747_s15  }
   0x5   : > { %s29_s23 = sadd.s32 1, %s588_s19  ;;  %s138_s24 = sadd.s32 1, %s580_s17 }
   0x6   : > { %p31_p0 = scmp.ge.s32.totalorder %s29_s23, 8  ;;  %p148_p1 = scmp.ne.s32.totalorder %s580_s17, %s576_s16 }
   0x7   : > { %p149_p2 = scmp.eq.s32.totalorder %s427_s21, 7  ;;  %p154_p3 = scmp.ne.s32.totalorder %s576_s16, %s572_s15 }
   0x8   : > { %s753_s23 = smov (%p31_p0, %s29_s23), 0  ;;  %p155_p5 = scmp.eq.s32.totalorder %s428_s22, 7 }
   0x9   : > { %p662_p4 = por %p149_p2, %p148_p1  ;;  %s133_s26 = ssub.s32 %s588_s19, %s753_s23 }
   0xa   : > { %p431_p6 = scmp.ge.s32.totalorder %s592_s20, 1  ;;  %p136_p7 = scmp.eq.s32.totalorder %s133_s26, 0 }
   0xb   : > { %p669_p8 = por %p155_p5, %p154_p3  ;;  %p203_p9 = scmp.lt.s32.totalorder %s592_s20, 9 }
   0xc   : > { %s675_s28 = scalar_select %p136_p7, %s580_s17, %s138_s24  }
   0xd   : > { %p204_p10 = pnand %p431_p6, %p203_p9 }
   0xe   : > { %p241_p11 = scmp.lt.s32.totalorder (!%p204_p10), %s584_s18, 7  ;;  %s238_s6 = sand.u32 (!%p204_p10), 1, %s576_s16  }
   0xf   : > { %207 = sbr.rel (%p204_p10) target bundleno = 175 (0xaf), region = 36  ;;  %s534_s5 = scalar_lea.hbm (!%p204_p10), %s744_s4, 64 }
  0x14   : > { %v594_v0 = vmov 0   ;;  %v595_v1 = vmov 2   ;;  %s242_s29 = scalar_select %p241_p11, %s584_s18, 7  ;;  %v596_v2 = vmov 1   ;;  %vm260_vm0 = vcmask 23552  }
  0x15   : > { %503 = vset.pattern.permute.xlu0 %v594_v0  ;;  %505 = vset.pattern.permute.xlu1 %v595_v1  ;;  %v508_v9 = vld [vmem:[%s742_s2] ss:$0 sm:$0xff]  ;;  %v510_v10 = vld [vmem:[%s742_s2 + $0x1] ss:$0 sm:$0xff]  ;;  %v509_v11 = vld [vmem:[%s742_s2 + $0x2] ss:$0 sm:$0xff] }
  0x16   : > { %507 = vset.pattern.permute.xlu2 %v596_v2  ;;  %s441_s30 = sshll.u32 %s242_s29, 4  ;;  %v511_v12 = vld [vmem:[%s742_s2 + $0x3] ss:$0 sm:$0xff]  ;;  %v512_v17 = vld [vmem:[%s742_s2 + $0x4] ss:$0 sm:$0xff]  ;;  %vm316_vm2 = vcmask 261120  }
  0x17   : > { %s248_s7 = scalar_lea.vmem %s740_s0, %s441_s30  ;;  %s443_s8 = sadd.s32 8, %s441_s30  ;;  %v513_v25 = vld [vmem:[%s743_s3] ss:$0 sm:$0xff] }
  0x18   : > { %v259_v3 = vld [vmem:[%s248_s7] sm:$0xff]  ;;  %s257_s11 = scalar_lea.vmem %s741_s1, %s443_s8  ;;  %s432_s7 = sshll.u32 %s238_s6, 3 }
  0x19   : > { %261 = vst.msk [vmem:[#allocation2] sm:$0xff] %vm260_vm0, %v259_v3  ;;  %v262_v4 = vld [vmem:[%s257_s11] sm:$0xff]  ;;  %s438_s8 = sshll.u32 %s584_s18, 3  ;;  %s240_s14 = scalar_lea.vmem [#allocation3], %s432_s7 }
  0x1a   : > { %263 = vst.msk [vmem:[#allocation2 + $0x8] sm:$0xff] %vm260_vm0, %v262_v4  ;;  %s330_s13 = scalar_lea.hbm %s744_s4, %s438_s8  ;;  %s332_s21 = sshll.u32 %s240_s14, 4  ;;  %s333_s21 = int_to_ptr.vmem [resolvable:$true] %s332_s21 }
  0x1b   : > { %s334_s22 = sshll.u32 %s330_s13, 4  ;;  %s319_s18 = scalar_lea.sflag [#allocation4], %s238_s6  ;;  %s335_s22 = int_to_ptr.hbm [resolvable:$true] %s334_s22 }
  0x1c   : > { %s528_s24 = sshra.s32 %s335_s22, 4  ;;  %s529_s24 = int_to_ptr.hbm [resolvable:$true] %s528_s24 }
  0x1d   : > { %s530_s26 = scalar_lea.hbm %s529_s24, 8  ;;  %p535_p1 = scmp.lt.s32.totalorder %s529_s24, %s744_s4 }
  0x1e   : > { %p531_p12 = scmp.ne.s32.totalorder %s529_s24, %s530_s26  ;;  %p536_p2 = scmp.lt.s32.totalorder %s534_s5, %s530_s26 }
  0x20   : > { %v264_v5 = vld [vmem:[#allocation2] sm:$0xff]  ;;  %p532_p13 = pnand %p531_p12, %p662_p4  ;;  %p537_p3 = por %p536_p2, %p535_p1 }
  0x21   : > { %268 = vperm.xlu0 %503, %v264_v5   ;;  %284 = vperm.xlu1 %505, %v264_v5   ;;  %v290_v6 = vld [vmem:[#allocation2 + $0x1] sm:$0xff] }
  0x22   : > { %302 = vperm.xlu2 %507, %v290_v6   ;;  %p533_p0 = pneg %p532_p13 }
  0x24   : > { %p538_p5 = pnand %p537_p3, %p533_p0 }
  0x29   : > { %504 = vset.pattern.permute.xlu0 %v596_v2  ;;  %506 = vset.pattern.permute.xlu1 %v594_v0 }
  0x2a   : > { %276 = vperm.xlu0 %504, %v264_v5   ;;  %294 = vperm.xlu1 %506, %v290_v6  }
  0x7c   : > { %v303_v18 = vpop.permute.xlu2 %302 }
  0x7d   : > { %v306_v23 = vmul.f32 %v512_v17, %v303_v18 }
  0x93   : > { %v269_v7 = vpop.permute.xlu0 %268  ;;  %v285_v8 = vpop.permute.xlu1 %284 }
  0x94   : > { %v272_v15 = vmul.f32 %v508_v9, %v269_v7  ;;  %v288_v19 = vmul.f32 %v509_v11, %v285_v8 }
  0x9c   : > { %v277_v13 = vpop.permute.xlu0 %276  ;;  %v295_v14 = vpop.permute.xlu1 %294 }
  0x9d   : > { %v280_v16 = vmul.f32 %v510_v10, %v277_v13  ;;  %v298_v21 = vmul.f32 %v511_v12, %v295_v14 }
  0x9f   : > { %v281_v20 = vadd.f32 %v280_v16, %v272_v15 }
  0xa1   : > { %v289_v22 = vadd.f32 %v288_v19, %v281_v20 }
  0xa3   : > { %v299_v24 = vadd.f32 %v298_v21, %v289_v22 }
  0xa5   : > { %v307_v26 = vadd.f32 %v306_v23, %v299_v24 }
  0xa7   : > { %v312_v27 = vadd.f32 %v513_v25, %v307_v26 }
  0xa9   : > { %v314_v28 = vmul.f32 0.1, %v312_v27  ;;  %vm313_vm1 = vcmp.ge.f32.partialorder %v312_v27, 0.0 }
  0xab   : > { %v315_v29 = vsel %vm313_vm1, %v312_v27, %v314_v28 }
  0xac   : > { %317 = vst.msk [vmem:[%s240_s14] sm:$0xff] %vm316_vm2, %v315_v29 }
  0xad   : > { %541 = shalt.err (!%p538_p5)
}
  0xae   : > { %445 = dma.vmem_to_hbm [thread:$0]  (%p662_p4), %s333_s21, 128, %s335_s22, %s319_s18  }
  0xaf PF: > { %p451_p6 = scmp.ge.s32.totalorder %s592_s20, 2  ;;  %s346_s6 = sand.u32 1, %s572_s15  }
  0xb0   : > { %s347_s9 = scalar_lea.sflag [#allocation4], %s346_s6 }
  0xb1   : > { %p448_p7 = pnand %p451_p6, %p669_p8 }
  0xb3   : > { %p449_p9 = pneg %p448_p7 }
  0xb5   : > { %567 = dma.done.wait (%p449_p9), %s347_s9, 128  }
  0xb6   : > { %569 = vsyncadd (%p449_p9), %s347_s9, 4294967168  ;;  %s17_s20 = sadd.s32 1, %s592_s20   ;;  %s747_s15 = smov %s576_s16 }
  0xb7   : > { %p14_p10 = scmp.ge.s32.totalorder %s17_s20, 10   ;;  %s748_s16 = smov %s580_s17 }
  0xb8   : > { %s749_s17 = smov %s675_s28  ;;  %s750_s18 = smov %s588_s19 }
  0xb9   : > { %s751_s19 = smov %s753_s23  ;;  %16 = sbr.rel (!%p14_p10) target bundleno = 4 (0x4), region = 74 }
  0xbe   :  { %353 = vsyncpa [#allocation4], 1 }
  0xbf   :  { %355 = vsyncpa [#allocation4 + $0x1], 1 }

</bundles_post_ra>
